<compile_context>
chip_gen: v6e
topology: v6e:2x2x1
jax: 0.10.0
libtpu: 0.0.40
codegen_flags: <defaults>
</compile_context>

<pallas_src>
import functools

import jax
import jax.numpy as jnp
from jax import lax
from jax.experimental import pallas as pl
from jax.experimental.pallas import tpu as pltpu


def _round_up(x, m):
    return ((x + m - 1) // m) * m


def _pick_tile(total, max_tile, quantum):
    """Largest multiple-of-`quantum` divisor of `total` that is <= max_tile."""
    t = min(total, max_tile)
    t -= t % quantum
    while total % t:
        t -= quantum
    return t


# -----------------------------------------------------------------------------
# Kernel 1: hoisted input projection + serial LSTM recurrence.
# -----------------------------------------------------------------------------
def lstm_kernel(x_ref, wih_ref, whh_ref, b_ref, hs_ref, gx_ref, *,
                batch, seq_len, hidden):
    """x_ref:   (T*Bp, E)   bf16, time-major rows (t*Bp + b)
       wih_ref: (E, 4H)     bf16, gate order [i, f, o, g]
       whh_ref: (H, 4H)     bf16, gate order [i, f, o, g]
       b_ref:   (1, 4H)     f32,  b_ih + b_hh, gate order [i, f, o, g]
       hs_ref:  (T, Bp, H)  f32   output: LSTM hidden states
       gx_ref:  (T, Bp, 4H) f32   scratch: per-step input-projection gates
    """
    Bp, T, H = batch, seq_len, hidden

    # Non-recurrent prologue: x @ W_ih + b for every timestep in one matmul.
    gx_ref[...] = (jnp.dot(x_ref[...], wih_ref[...],
                           preferred_element_type=jnp.float32)
                   + b_ref[...]).reshape(T, Bp, 4 * H)

    w_hh = whh_ref[...]                       # bf16, hoisted out of the loop
    # TODO(synk): at large H, drive the MXU with matmul_push_rhs/acc_lhs/pop so
    # W_hh stays resident in the weight registers across all T steps.

    def step(t, carry):
        h, c = carry                          # f32 recurrent state
        gates = gx_ref[t] + jnp.dot(h.astype(jnp.bfloat16), w_hh,
                                    preferred_element_type=jnp.float32)
        # gate layout [i, f, o, g]: one sigmoid over 3H, one tanh over H.
        sig = 0.5 * (jnp.tanh(0.5 * gates[:, :3 * H]) + 1.0)
        i_g = sig[:, 0 * H:1 * H]
        f_g = sig[:, 1 * H:2 * H]
        o_g = sig[:, 2 * H:3 * H]
        g_g = jnp.tanh(gates[:, 3 * H:])
        c = f_g * c + i_g * g_g
        h = o_g * jnp.tanh(c)
        hs_ref[t] = h                         # store now -> bounded live range
        return (h, c)

    h0 = jnp.zeros((Bp, H), jnp.float32)
    unroll = True if T <= 16 else 8           # keep vreg pressure bounded at big T
    lax.fori_loop(0, T, step, (h0, h0), unroll=unroll)


# -----------------------------------------------------------------------------
# Kernel 2: FC projection, tiled over (row tiles, vocab tiles), both parallel.
# -----------------------------------------------------------------------------
def fc_kernel(h_ref, w_ref, b_ref, o_ref):
    o_ref[...] = (jnp.dot(h_ref[...].astype(jnp.bfloat16), w_ref[...],
                          preferred_element_type=jnp.float32)
                  + b_ref[...])


# -----------------------------------------------------------------------------
# Wrapper
# -----------------------------------------------------------------------------
def decoder_rnn_forward(features, captions, params):
    """features: (B, E) f32, captions: (B, L) int32 -> logits (B, L, V) f32."""
    emb_table = params["embedding"]        # (V, E)
    w_ih = params["w_ih"]                  # (E, 4H)  PyTorch gate order i,f,g,o
    w_hh = params["w_hh"]                  # (H, 4H)
    b = params["b"]                        # (1, 4H)  b_ih + b_hh
    w_fc = params["w_fc"]                  # (H, V)
    b_fc = params["b_fc"]                  # (1, V)

    B, E = features.shape
    H = w_hh.shape[0]
    V = w_fc.shape[1]
    Bp = _round_up(max(B, 8), 8)           # sublane-pad the batch
    Vp = _round_up(V, 128)                 # lane-pad vocab -> unmasked stores

    # --- glue: embedding lookup + concat (XLA) ---
    embeds = jnp.take(emb_table, captions[:, :-1], axis=0)          # (B, L-1, E)
    seq = jnp.concatenate([features[:, None, :], embeds], axis=1)   # (B, T, E)
    T = seq.shape[1]

    # time-major + batch pad: per-step gate reads become contiguous slices
    seq_tm = jnp.transpose(seq, (1, 0, 2))                          # (T, B, E)
    seq_tm = jnp.pad(seq_tm, ((0, 0), (0, Bp - B), (0, 0)))
    x2d = seq_tm.reshape(T * Bp, E).astype(jnp.bfloat16)

    # gate reorder i,f,g,o -> i,f,o,g + bf16 weights (constant-folded under jit)
    def reorder(m):
        return jnp.concatenate(
            [m[:, 0 * H:1 * H], m[:, 1 * H:2 * H],
             m[:, 3 * H:4 * H], m[:, 2 * H:3 * H]], axis=1)

    w_ih_k = reorder(w_ih).astype(jnp.bfloat16)
    w_hh_k = reorder(w_hh).astype(jnp.bfloat16)
    b_k = reorder(b).astype(jnp.float32)

    vmem_specs = [pl.BlockSpec(memory_space=pltpu.MemorySpace.VMEM)
                  for _ in range(4)]

    hs = pl.pallas_call(
        functools.partial(lstm_kernel, batch=Bp, seq_len=T, hidden=H),
        out_shape=jax.ShapeDtypeStruct((T, Bp, H), jnp.float32),
        in_specs=vmem_specs,
        out_specs=pl.BlockSpec(memory_space=pltpu.MemorySpace.VMEM),
        scratch_shapes=[pltpu.VMEM((T, Bp, 4 * H), jnp.float32)],
    )(x2d, w_ih_k, w_hh_k, b_k)

    # --- FC projection: separate gridded call (keeps W_fc out of the
    #     recurrent kernel's VMEM; both v7x TCs can work on it) ---
    rows = T * Bp
    tile_m = _pick_tile(rows, 256, 8)
    tile_n = _pick_tile(Vp, 1024, 128)
    w_fc_p = jnp.pad(w_fc, ((0, 0), (0, Vp - V))).astype(jnp.bfloat16)
    b_fc_p = jnp.pad(b_fc, ((0, 0), (0, Vp - V)))

    logits_p = pl.pallas_call(
        fc_kernel,
        out_shape=jax.ShapeDtypeStruct((rows, Vp), jnp.float32),
        grid_spec=pltpu.PrefetchScalarGridSpec(
            num_scalar_prefetch=0,
            grid=(rows // tile_m, Vp // tile_n),
            in_specs=[pl.BlockSpec((tile_m, H), lambda i, j: (i, 0)),
                      pl.BlockSpec((H, tile_n), lambda i, j: (0, j)),
                      pl.BlockSpec((1, tile_n), lambda i, j: (0, j))],
            out_specs=pl.BlockSpec((tile_m, tile_n), lambda i, j: (i, j)),
        ),
        compiler_params=pltpu.CompilerParams(
            dimension_semantics=("parallel", "parallel")),
    )(hs.reshape(rows, H), w_fc_p, b_fc_p)

    # unpad: rows are t*Bp + b (time-major); slice off batch & vocab padding
    logits = logits_p.reshape(T, Bp, Vp)[:, :B, :V]
    return jnp.transpose(logits, (1, 0, 2))           # (B, T, V) batch-first


def make_params(key, embed_size, hidden_size, vocab_size):
    """Deterministic synthetic parameters matching nn.Embedding / nn.LSTM / nn.Linear."""
    ks = jax.random.split(key, 6)
    k_lstm = 1.0 / jnp.sqrt(hidden_size)
    # nn.Embedding default: N(0,1)
    emb = jax.random.normal(ks[0], (vocab_size, embed_size), jnp.float32)
    # nn.LSTM default: U(-1/sqrt(H), 1/sqrt(H)); stored pre-transposed to (in, 4H)
    w_ih = jax.random.uniform(ks[1], (embed_size, 4 * hidden_size), jnp.float32,
                              -k_lstm, k_lstm)
    w_hh = jax.random.uniform(ks[2], (hidden_size, 4 * hidden_size), jnp.float32,
                              -k_lstm, k_lstm)
    b_ih = jax.random.uniform(ks[3], (4 * hidden_size,), jnp.float32, -k_lstm, k_lstm)
    b_hh = jax.random.uniform(ks[4], (4 * hidden_size,), jnp.float32, -k_lstm, k_lstm)
    # init_weights(): fc.weight ~ U(-1, 1), fc.bias = 0
    w_fc = jax.random.uniform(ks[5], (hidden_size, vocab_size), jnp.float32, -1.0, 1.0)
    b_fc = jnp.zeros((vocab_size,), jnp.float32)
    return {
        "embedding": emb,
        "w_ih": w_ih,
        "w_hh": w_hh,
        "b": (b_ih + b_hh)[None, :],
        "w_fc": w_fc,
        "b_fc": b_fc[None, :],
    }


def reference_forward(features, captions, params):
    """Pure-JAX f32 reference (lax.scan LSTM), PyTorch gate order i,f,g,o."""
    embeds = jnp.take(params["embedding"], captions[:, :-1], axis=0)
    seq = jnp.concatenate([features[:, None, :], embeds], axis=1)   # (B, T, E)
    B = seq.shape[0]
    H = params["w_hh"].shape[0]

    def step(carry, x_t):
        h, c = carry
        gates = x_t @ params["w_ih"] + h @ params["w_hh"] + params["b"]
        i = jax.nn.sigmoid(gates[:, 0 * H:1 * H])
        f = jax.nn.sigmoid(gates[:, 1 * H:2 * H])
        g = jnp.tanh(gates[:, 2 * H:3 * H])
        o = jax.nn.sigmoid(gates[:, 3 * H:4 * H])
        c = f * c + i * g
        h = o * jnp.tanh(c)
        return (h, c), h

    h0 = jnp.zeros((B, H), jnp.float32)
    _, hs = jax.lax.scan(step, (h0, h0), jnp.transpose(seq, (1, 0, 2)))
    lstm_out = jnp.transpose(hs, (1, 0, 2))                          # (B, T, H)
    return lstm_out @ params["w_fc"] + params["b_fc"]


if __name__ == "__main__":
    B = 2            # batch
    L = 8            # caption length (sequence length after concat is also 8)
    EMBED = 32
    HIDDEN = 32
    VOCAB = 40

    key = jax.random.PRNGKey(0)
    k_p, k_f, k_c = jax.random.split(key, 3)

    params = make_params(k_p, EMBED, HIDDEN, VOCAB)
    features = jax.random.normal(k_f, (B, EMBED), jnp.float32)
    captions = jax.random.randint(k_c, (B, L), 0, VOCAB, dtype=jnp.int32)

    fwd = jax.jit(functools.partial(decoder_rnn_forward, params=params))
    out = jax.block_until_ready(fwd(features, captions))
    assert out.shape == (B, L, VOCAB), out.shape

    ref = reference_forward(features, captions, params)
    # bf16 MXU operands -> allow bf16-level tolerance against the f32 reference.
    max_err = float(jnp.max(jnp.abs(out - ref)))
    assert jnp.allclose(out, ref, atol=5e-2, rtol=5e-2), max_err

    print("KERNEL_OK")
</pallas_src>

<mosaic_0001>
module attributes {stable_mosaic.version = 11 : i64} {
  func.func @fc_kernel(%arg0: i32, %arg1: i32, %arg2: memref<64x32xf32, #tpu.memory_space<vmem>>, %arg3: memref<32x128xbf16, #tpu.memory_space<vmem>>, %arg4: memref<1x128xf32, #tpu.memory_space<vmem>>, %arg5: memref<64x128xf32, #tpu.memory_space<vmem>>) attributes {dimension_semantics = [#tpu.dimension_semantics<parallel>, #tpu.dimension_semantics<parallel>], iteration_bounds = array<i64: 1, 1>, scalar_prefetch = 0 : i64, scratch_operands = 0 : i64, tpu.core_type = #tpu.core_type<tc>, window_params = [{transform_indices = @transform_0, window_bounds = array<i64: 64, 32>}, {transform_indices = @transform_1, window_bounds = array<i64: 32, 128>}, {transform_indices = @transform_2, window_bounds = array<i64: 1, 128>}, {transform_indices = @transform_3, window_bounds = array<i64: 64, 128>}]} {
    %c0 = arith.constant 0 : index
    %c0_0 = arith.constant 0 : index
    %0 = vector.load %arg2[%c0, %c0_0] : memref<64x32xf32, #tpu.memory_space<vmem>>, vector<64x32xf32>
    %1 = arith.truncf %0 : vector<64x32xf32> to vector<64x32xbf16>
    %c0_1 = arith.constant 0 : index
    %c0_2 = arith.constant 0 : index
    %2 = vector.load %arg3[%c0_1, %c0_2] : memref<32x128xbf16, #tpu.memory_space<vmem>>, vector<32x128xbf16>
    %cst = arith.constant dense<0.000000e+00> : vector<64x128xf32>
    %3 = tpu.matmul %1, %2, %cst {dimension_numbers = #tpu.dot_dimension_numbers<[1], [0], [0], [1], [0, 0, 1, 1], [], []>} : vector<64x32xbf16>, vector<32x128xbf16>, vector<64x128xf32> -> vector<64x128xf32>
    %c0_3 = arith.constant 0 : index
    %c0_4 = arith.constant 0 : index
    %4 = vector.load %arg4[%c0_3, %c0_4] : memref<1x128xf32, #tpu.memory_space<vmem>>, vector<1x128xf32>
    %5 = vector.broadcast %4 : vector<1x128xf32> to vector<64x128xf32>
    %6 = arith.addf %3, %5 : vector<64x128xf32>
    %c0_5 = arith.constant 0 : index
    %c0_6 = arith.constant 0 : index
    %7 = vector.load %arg5[%c0_5, %c0_6] : memref<64x128xf32, #tpu.memory_space<vmem>>, vector<64x128xf32>
    tpu.vector_store %arg5[%c0_5, %c0_6], %6 {strides = array<i32>} : memref<64x128xf32, #tpu.memory_space<vmem>>, vector<64x128xf32>,
    return
  }
  func.func @transform_0(%arg0: i32, %arg1: i32) -> (i32, i32) {
    %c0_i32 = arith.constant 0 : i32
    %c0_i32_0 = arith.constant 0 : i32
    return %arg0, %c0_i32 : i32, i32
  }
  func.func @transform_1(%arg0: i32, %arg1: i32) -> (i32, i32) {
    %c0_i32 = arith.constant 0 : i32
    %c0_i32_0 = arith.constant 0 : i32
    return %c0_i32, %arg1 : i32, i32
  }
  func.func @transform_2(%arg0: i32, %arg1: i32) -> (i32, i32) {
    %c0_i32 = arith.constant 0 : i32
    %c0_i32_0 = arith.constant 0 : i32
    return %c0_i32, %arg1 : i32, i32
  }
  func.func @transform_3(%arg0: i32, %arg1: i32) -> (i32, i32) {
    %c0_i32 = arith.constant 0 : i32
    return %arg0, %arg1 : i32, i32
  }
}

module attributes {stable_mosaic.version = 11 : i64} {
  func.func @lstm_kernel(%arg0: memref<64x32xbf16, #tpu.memory_space<vmem>>, %arg1: memref<32x128xbf16, #tpu.memory_space<vmem>>, %arg2: memref<32x128xbf16, #tpu.memory_space<vmem>>, %arg3: memref<1x128xf32, #tpu.memory_space<vmem>>, %arg4: memref<8x8x32xf32, #tpu.memory_space<vmem>>, %arg5: memref<8x8x128xf32, #tpu.memory_space<vmem>>) attributes {dimension_semantics = [], scalar_prefetch = 0 : i64, scratch_operands = 1 : i64, tpu.core_type = #tpu.core_type<tc>} {
    %c0 = arith.constant 0 : index
    %c0_0 = arith.constant 0 : index
    %0 = vector.load %arg0[%c0, %c0_0] : memref<64x32xbf16, #tpu.memory_space<vmem>>, vector<64x32xbf16>
    %c0_1 = arith.constant 0 : index
    %c0_2 = arith.constant 0 : index
    %1 = vector.load %arg1[%c0_1, %c0_2] : memref<32x128xbf16, #tpu.memory_space<vmem>>, vector<32x128xbf16>
    %cst = arith.constant dense<0.000000e+00> : vector<64x128xf32>
    %2 = tpu.matmul %0, %1, %cst {dimension_numbers = #tpu.dot_dimension_numbers<[1], [0], [0], [1], [0, 0, 1, 1], [], []>} : vector<64x32xbf16>, vector<32x128xbf16>, vector<64x128xf32> -> vector<64x128xf32>
    %c0_3 = arith.constant 0 : index
    %c0_4 = arith.constant 0 : index
    %3 = vector.load %arg3[%c0_3, %c0_4] : memref<1x128xf32, #tpu.memory_space<vmem>>, vector<1x128xf32>
    %4 = vector.broadcast %3 : vector<1x128xf32> to vector<64x128xf32>
    %5 = arith.addf %2, %4 : vector<64x128xf32>
    %6 = vector.shape_cast %5 : vector<64x128xf32> to vector<8x8x128xf32>
    %c0_5 = arith.constant 0 : index
    %c0_6 = arith.constant 0 : index
    %c0_7 = arith.constant 0 : index
    %7 = vector.load %arg5[%c0_5, %c0_6, %c0_7] : memref<8x8x128xf32, #tpu.memory_space<vmem>>, vector<8x8x128xf32>
    tpu.vector_store %arg5[%c0_5, %c0_6, %c0_7], %6 {strides = array<i32>} : memref<8x8x128xf32, #tpu.memory_space<vmem>>, vector<8x8x128xf32>,
    %c0_8 = arith.constant 0 : index
    %c0_9 = arith.constant 0 : index
    %8 = vector.load %arg2[%c0_8, %c0_9] : memref<32x128xbf16, #tpu.memory_space<vmem>>, vector<32x128xbf16>
    %cst_10 = arith.constant 0.000000e+00 : f32
    %9 = vector.broadcast %cst_10 : f32 to vector<8x32xf32>
    %c0_i32 = arith.constant 0 : i32
    %10 = arith.index_cast %c0_i32 : i32 to index
    %c0_11 = arith.constant 0 : index
    %c0_12 = arith.constant 0 : index
    %11 = vector.load %arg5[%10, %c0_11, %c0_12] : memref<8x8x128xf32, #tpu.memory_space<vmem>>, vector<1x8x128xf32>
    %12 = vector.shape_cast %11 : vector<1x8x128xf32> to vector<8x128xf32>
    %13 = arith.truncf %9 : vector<8x32xf32> to vector<8x32xbf16>
    %cst_13 = arith.constant dense<0.000000e+00> : vector<8x128xf32>
    %14 = tpu.matmul %13, %8, %cst_13 {dimension_numbers = #tpu.dot_dimension_numbers<[1], [0], [0], [1], [0, 0, 1, 1], [], []>} : vector<8x32xbf16>, vector<32x128xbf16>, vector<8x128xf32> -> vector<8x128xf32>
    %15 = arith.addf %12, %14 : vector<8x128xf32>
    %16 = vector.extract_strided_slice %15 {offsets = [0, 0], sizes = [8, 96], strides = [1, 1]} : vector<8x128xf32> to vector<8x96xf32>
    %cst_14 = arith.constant 5.000000e-01 : f32
    %17 = vector.broadcast %cst_14 : f32 to vector<8x96xf32>
    %18 = arith.mulf %17, %16 : vector<8x96xf32>
    %19 = math.tanh %18 : vector<8x96xf32>
    %cst_15 = arith.constant 1.000000e+00 : f32
    %20 = vector.broadcast %cst_15 : f32 to vector<8x96xf32>
    %21 = arith.addf %19, %20 : vector<8x96xf32>
    %cst_16 = arith.constant 5.000000e-01 : f32
    %22 = vector.broadcast %cst_16 : f32 to vector<8x96xf32>
    %23 = arith.mulf %22, %21 : vector<8x96xf32>
    %24 = vector.extract_strided_slice %23 {offsets = [0, 0], sizes = [8, 32], strides = [1, 1]} : vector<8x96xf32> to vector<8x32xf32>
    %25 = vector.extract_strided_slice %23 {offsets = [0, 32], sizes = [8, 32], strides = [1, 1]} : vector<8x96xf32> to vector<8x32xf32>
    %26 = vector.extract_strided_slice %23 {offsets = [0, 64], sizes = [8, 32], strides = [1, 1]} : vector<8x96xf32> to vector<8x32xf32>
    %27 = vector.extract_strided_slice %15 {offsets = [0, 96], sizes = [8, 32], strides = [1, 1]} : vector<8x128xf32> to vector<8x32xf32>
    %28 = math.tanh %27 : vector<8x32xf32>
    %29 = arith.mulf %25, %9 : vector<8x32xf32>
    %30 = arith.mulf %24, %28 : vector<8x32xf32>
    %31 = arith.addf %29, %30 : vector<8x32xf32>
    %32 = math.tanh %31 : vector<8x32xf32>
    %33 = arith.mulf %26, %32 : vector<8x32xf32>
    %34 = arith.index_cast %c0_i32 : i32 to index
    %c0_17 = arith.constant 0 : index
    %c0_18 = arith.constant 0 : index
    %35 = vector.load %arg4[%34, %c0_17, %c0_18] : memref<8x8x32xf32, #tpu.memory_space<vmem>>, vector<1x8x32xf32>
    %36 = vector.shape_cast %35 : vector<1x8x32xf32> to vector<8x32xf32>
    %37 = vector.shape_cast %33 : vector<8x32xf32> to vector<1x8x32xf32>
    tpu.vector_store %arg4[%34, %c0_17, %c0_18], %37 {strides = array<i32>} : memref<8x8x32xf32, #tpu.memory_space<vmem>>, vector<1x8x32xf32>,
    %c1_i32 = arith.constant 1 : i32
    %38 = arith.index_cast %c1_i32 : i32 to index
    %c0_19 = arith.constant 0 : index
    %c0_20 = arith.constant 0 : index
    %39 = vector.load %arg5[%38, %c0_19, %c0_20] : memref<8x8x128xf32, #tpu.memory_space<vmem>>, vector<1x8x128xf32>
    %40 = vector.shape_cast %39 : vector<1x8x128xf32> to vector<8x128xf32>
    %41 = arith.truncf %33 : vector<8x32xf32> to vector<8x32xbf16>
    %cst_21 = arith.constant dense<0.000000e+00> : vector<8x128xf32>
    %42 = tpu.matmul %41, %8, %cst_21 {dimension_numbers = #tpu.dot_dimension_numbers<[1], [0], [0], [1], [0, 0, 1, 1], [], []>} : vector<8x32xbf16>, vector<32x128xbf16>, vector<8x128xf32> -> vector<8x128xf32>
    %43 = arith.addf %40, %42 : vector<8x128xf32>
    %44 = vector.extract_strided_slice %43 {offsets = [0, 0], sizes = [8, 96], strides = [1, 1]} : vector<8x128xf32> to vector<8x96xf32>
    %cst_22 = arith.constant 5.000000e-01 : f32
    %45 = vector.broadcast %cst_22 : f32 to vector<8x96xf32>
    %46 = arith.mulf %45, %44 : vector<8x96xf32>
    %47 = math.tanh %46 : vector<8x96xf32>
    %cst_23 = arith.constant 1.000000e+00 : f32
    %48 = vector.broadcast %cst_23 : f32 to vector<8x96xf32>
    %49 = arith.addf %47, %48 : vector<8x96xf32>
    %cst_24 = arith.constant 5.000000e-01 : f32
    %50 = vector.broadcast %cst_24 : f32 to vector<8x96xf32>
    %51 = arith.mulf %50, %49 : vector<8x96xf32>
    %52 = vector.extract_strided_slice %51 {offsets = [0, 0], sizes = [8, 32], strides = [1, 1]} : vector<8x96xf32> to vector<8x32xf32>
    %53 = vector.extract_strided_slice %51 {offsets = [0, 32], sizes = [8, 32], strides = [1, 1]} : vector<8x96xf32> to vector<8x32xf32>
    %54 = vector.extract_strided_slice %51 {offsets = [0, 64], sizes = [8, 32], strides = [1, 1]} : vector<8x96xf32> to vector<8x32xf32>
    %55 = vector.extract_strided_slice %43 {offsets = [0, 96], sizes = [8, 32], strides = [1, 1]} : vector<8x128xf32> to vector<8x32xf32>
    %56 = math.tanh %55 : vector<8x32xf32>
    %57 = arith.mulf %53, %31 : vector<8x32xf32>
    %58 = arith.mulf %52, %56 : vector<8x32xf32>
    %59 = arith.addf %57, %58 : vector<8x32xf32>
    %60 = math.tanh %59 : vector<8x32xf32>
    %61 = arith.mulf %54, %60 : vector<8x32xf32>
    %62 = arith.index_cast %c1_i32 : i32 to index
    %c0_25 = arith.constant 0 : index
    %c0_26 = arith.constant 0 : index
    %63 = vector.load %arg4[%62, %c0_25, %c0_26] : memref<8x8x32xf32, #tpu.memory_space<vmem>>, vector<1x8x32xf32>
    %64 = vector.shape_cast %63 : vector<1x8x32xf32> to vector<8x32xf32>
    %65 = vector.shape_cast %61 : vector<8x32xf32> to vector<1x8x32xf32>
    tpu.vector_store %arg4[%62, %c0_25, %c0_26], %65 {strides = array<i32>} : memref<8x8x32xf32, #tpu.memory_space<vmem>>, vector<1x8x32xf32>,
    %c2_i32 = arith.constant 2 : i32
    %66 = arith.index_cast %c2_i32 : i32 to index
    %c0_27 = arith.constant 0 : index
    %c0_28 = arith.constant 0 : index
    %67 = vector.load %arg5[%66, %c0_27, %c0_28] : memref<8x8x128xf32, #tpu.memory_space<vmem>>, vector<1x8x128xf32>
    %68 = vector.shape_cast %67 : vector<1x8x128xf32> to vector<8x128xf32>
    %69 = arith.truncf %61 : vector<8x32xf32> to vector<8x32xbf16>
    %cst_29 = arith.constant dense<0.000000e+00> : vector<8x128xf32>
    %70 = tpu.matmul %69, %8, %cst_29 {dimension_numbers = #tpu.dot_dimension_numbers<[1], [0], [0], [1], [0, 0, 1, 1], [], []>} : vector<8x32xbf16>, vector<32x128xbf16>, vector<8x128xf32> -> vector<8x128xf32>
    %71 = arith.addf %68, %70 : vector<8x128xf32>
    %72 = vector.extract_strided_slice %71 {offsets = [0, 0], sizes = [8, 96], strides = [1, 1]} : vector<8x128xf32> to vector<8x96xf32>
    %cst_30 = arith.constant 5.000000e-01 : f32
    %73 = vector.broadcast %cst_30 : f32 to vector<8x96xf32>
    %74 = arith.mulf %73, %72 : vector<8x96xf32>
    %75 = math.tanh %74 : vector<8x96xf32>
    %cst_31 = arith.constant 1.000000e+00 : f32
    %76 = vector.broadcast %cst_31 : f32 to vector<8x96xf32>
    %77 = arith.addf %75, %76 : vector<8x96xf32>
    %cst_32 = arith.constant 5.000000e-01 : f32
    %78 = vector.broadcast %cst_32 : f32 to vector<8x96xf32>
    %79 = arith.mulf %78, %77 : vector<8x96xf32>
    %80 = vector.extract_strided_slice %79 {offsets = [0, 0], sizes = [8, 32], strides = [1, 1]} : vector<8x96xf32> to vector<8x32xf32>
    %81 = vector.extract_strided_slice %79 {offsets = [0, 32], sizes = [8, 32], strides = [1, 1]} : vector<8x96xf32> to vector<8x32xf32>
    %82 = vector.extract_strided_slice %79 {offsets = [0, 64], sizes = [8, 32], strides = [1, 1]} : vector<8x96xf32> to vector<8x32xf32>
    %83 = vector.extract_strided_slice %71 {offsets = [0, 96], sizes = [8, 32], strides = [1, 1]} : vector<8x128xf32> to vector<8x32xf32>
    %84 = math.tanh %83 : vector<8x32xf32>
    %85 = arith.mulf %81, %59 : vector<8x32xf32>
    %86 = arith.mulf %80, %84 : vector<8x32xf32>
    %87 = arith.addf %85, %86 : vector<8x32xf32>
    %88 = math.tanh %87 : vector<8x32xf32>
    %89 = arith.mulf %82, %88 : vector<8x32xf32>
    %90 = arith.index_cast %c2_i32 : i32 to index
    %c0_33 = arith.constant 0 : index
    %c0_34 = arith.constant 0 : index
    %91 = vector.load %arg4[%90, %c0_33, %c0_34] : memref<8x8x32xf32, #tpu.memory_space<vmem>>, vector<1x8x32xf32>
    %92 = vector.shape_cast %91 : vector<1x8x32xf32> to vector<8x32xf32>
    %93 = vector.shape_cast %89 : vector<8x32xf32> to vector<1x8x32xf32>
    tpu.vector_store %arg4[%90, %c0_33, %c0_34], %93 {strides = array<i32>} : memref<8x8x32xf32, #tpu.memory_space<vmem>>, vector<1x8x32xf32>,
    %c3_i32 = arith.constant 3 : i32
    %94 = arith.index_cast %c3_i32 : i32 to index
    %c0_35 = arith.constant 0 : index
    %c0_36 = arith.constant 0 : index
    %95 = vector.load %arg5[%94, %c0_35, %c0_36] : memref<8x8x128xf32, #tpu.memory_space<vmem>>, vector<1x8x128xf32>
    %96 = vector.shape_cast %95 : vector<1x8x128xf32> to vector<8x128xf32>
    %97 = arith.truncf %89 : vector<8x32xf32> to vector<8x32xbf16>
    %cst_37 = arith.constant dense<0.000000e+00> : vector<8x128xf32>
    %98 = tpu.matmul %97, %8, %cst_37 {dimension_numbers = #tpu.dot_dimension_numbers<[1], [0], [0], [1], [0, 0, 1, 1], [], []>} : vector<8x32xbf16>, vector<32x128xbf16>, vector<8x128xf32> -> vector<8x128xf32>
    %99 = arith.addf %96, %98 : vector<8x128xf32>
    %100 = vector.extract_strided_slice %99 {offsets = [0, 0], sizes = [8, 96], strides = [1, 1]} : vector<8x128xf32> to vector<8x96xf32>
    %cst_38 = arith.constant 5.000000e-01 : f32
    %101 = vector.broadcast %cst_38 : f32 to vector<8x96xf32>
    %102 = arith.mulf %101, %100 : vector<8x96xf32>
    %103 = math.tanh %102 : vector<8x96xf32>
    %cst_39 = arith.constant 1.000000e+00 : f32
    %104 = vector.broadcast %cst_39 : f32 to vector<8x96xf32>
    %105 = arith.addf %103, %104 : vector<8x96xf32>
    %cst_40 = arith.constant 5.000000e-01 : f32
    %106 = vector.broadcast %cst_40 : f32 to vector<8x96xf32>
    %107 = arith.mulf %106, %105 : vector<8x96xf32>
    %108 = vector.extract_strided_slice %107 {offsets = [0, 0], sizes = [8, 32], strides = [1, 1]} : vector<8x96xf32> to vector<8x32xf32>
    %109 = vector.extract_strided_slice %107 {offsets = [0, 32], sizes = [8, 32], strides = [1, 1]} : vector<8x96xf32> to vector<8x32xf32>
    %110 = vector.extract_strided_slice %107 {offsets = [0, 64], sizes = [8, 32], strides = [1, 1]} : vector<8x96xf32> to vector<8x32xf32>
    %111 = vector.extract_strided_slice %99 {offsets = [0, 96], sizes = [8, 32], strides = [1, 1]} : vector<8x128xf32> to vector<8x32xf32>
    %112 = math.tanh %111 : vector<8x32xf32>
    %113 = arith.mulf %109, %87 : vector<8x32xf32>
    %114 = arith.mulf %108, %112 : vector<8x32xf32>
    %115 = arith.addf %113, %114 : vector<8x32xf32>
    %116 = math.tanh %115 : vector<8x32xf32>
    %117 = arith.mulf %110, %116 : vector<8x32xf32>
    %118 = arith.index_cast %c3_i32 : i32 to index
    %c0_41 = arith.constant 0 : index
    %c0_42 = arith.constant 0 : index
    %119 = vector.load %arg4[%118, %c0_41, %c0_42] : memref<8x8x32xf32, #tpu.memory_space<vmem>>, vector<1x8x32xf32>
    %120 = vector.shape_cast %119 : vector<1x8x32xf32> to vector<8x32xf32>
    %121 = vector.shape_cast %117 : vector<8x32xf32> to vector<1x8x32xf32>
    tpu.vector_store %arg4[%118, %c0_41, %c0_42], %121 {strides = array<i32>} : memref<8x8x32xf32, #tpu.memory_space<vmem>>, vector<1x8x32xf32>,
    %c4_i32 = arith.constant 4 : i32
    %122 = arith.index_cast %c4_i32 : i32 to index
    %c0_43 = arith.constant 0 : index
    %c0_44 = arith.constant 0 : index
    %123 = vector.load %arg5[%122, %c0_43, %c0_44] : memref<8x8x128xf32, #tpu.memory_space<vmem>>, vector<1x8x128xf32>
    %124 = vector.shape_cast %123 : vector<1x8x128xf32> to vector<8x128xf32>
    %125 = arith.truncf %117 : vector<8x32xf32> to vector<8x32xbf16>
    %cst_45 = arith.constant dense<0.000000e+00> : vector<8x128xf32>
    %126 = tpu.matmul %125, %8, %cst_45 {dimension_numbers = #tpu.dot_dimension_numbers<[1], [0], [0], [1], [0, 0, 1, 1], [], []>} : vector<8x32xbf16>, vector<32x128xbf16>, vector<8x128xf32> -> vector<8x128xf32>
    %127 = arith.addf %124, %126 : vector<8x128xf32>
    %128 = vector.extract_strided_slice %127 {offsets = [0, 0], sizes = [8, 96], strides = [1, 1]} : vector<8x128xf32> to vector<8x96xf32>
    %cst_46 = arith.constant 5.000000e-01 : f32
    %129 = vector.broadcast %cst_46 : f32 to vector<8x96xf32>
    %130 = arith.mulf %129, %128 : vector<8x96xf32>
    %131 = math.tanh %130 : vector<8x96xf32>
    %cst_47 = arith.constant 1.000000e+00 : f32
    %132 = vector.broadcast %cst_47 : f32 to vector<8x96xf32>
    %133 = arith.addf %131, %132 : vector<8x96xf32>
    %cst_48 = arith.constant 5.000000e-01 : f32
    %134 = vector.broadcast %cst_48 : f32 to vector<8x96xf32>
    %135 = arith.mulf %134, %133 : vector<8x96xf32>
    %136 = vector.extract_strided_slice %135 {offsets = [0, 0], sizes = [8, 32], strides = [1, 1]} : vector<8x96xf32> to vector<8x32xf32>
    %137 = vector.extract_strided_slice %135 {offsets = [0, 32], sizes = [8, 32], strides = [1, 1]} : vector<8x96xf32> to vector<8x32xf32>
    %138 = vector.extract_strided_slice %135 {offsets = [0, 64], sizes = [8, 32], strides = [1, 1]} : vector<8x96xf32> to vector<8x32xf32>
    %139 = vector.extract_strided_slice %127 {offsets = [0, 96], sizes = [8, 32], strides = [1, 1]} : vector<8x128xf32> to vector<8x32xf32>
    %140 = math.tanh %139 : vector<8x32xf32>
    %141 = arith.mulf %137, %115 : vector<8x32xf32>
    %142 = arith.mulf %136, %140 : vector<8x32xf32>
    %143 = arith.addf %141, %142 : vector<8x32xf32>
    %144 = math.tanh %143 : vector<8x32xf32>
    %145 = arith.mulf %138, %144 : vector<8x32xf32>
    %146 = arith.index_cast %c4_i32 : i32 to index
    %c0_49 = arith.constant 0 : index
    %c0_50 = arith.constant 0 : index
    %147 = vector.load %arg4[%146, %c0_49, %c0_50] : memref<8x8x32xf32, #tpu.memory_space<vmem>>, vector<1x8x32xf32>
    %148 = vector.shape_cast %147 : vector<1x8x32xf32> to vector<8x32xf32>
    %149 = vector.shape_cast %145 : vector<8x32xf32> to vector<1x8x32xf32>
    tpu.vector_store %arg4[%146, %c0_49, %c0_50], %149 {strides = array<i32>} : memref<8x8x32xf32, #tpu.memory_space<vmem>>, vector<1x8x32xf32>,
    %c5_i32 = arith.constant 5 : i32
    %150 = arith.index_cast %c5_i32 : i32 to index
    %c0_51 = arith.constant 0 : index
    %c0_52 = arith.constant 0 : index
    %151 = vector.load %arg5[%150, %c0_51, %c0_52] : memref<8x8x128xf32, #tpu.memory_space<vmem>>, vector<1x8x128xf32>
    %152 = vector.shape_cast %151 : vector<1x8x128xf32> to vector<8x128xf32>
    %153 = arith.truncf %145 : vector<8x32xf32> to vector<8x32xbf16>
    %cst_53 = arith.constant dense<0.000000e+00> : vector<8x128xf32>
    %154 = tpu.matmul %153, %8, %cst_53 {dimension_numbers = #tpu.dot_dimension_numbers<[1], [0], [0], [1], [0, 0, 1, 1], [], []>} : vector<8x32xbf16>, vector<32x128xbf16>, vector<8x128xf32> -> vector<8x128xf32>
    %155 = arith.addf %152, %154 : vector<8x128xf32>
    %156 = vector.extract_strided_slice %155 {offsets = [0, 0], sizes = [8, 96], strides = [1, 1]} : vector<8x128xf32> to vector<8x96xf32>
    %cst_54 = arith.constant 5.000000e-01 : f32
    %157 = vector.broadcast %cst_54 : f32 to vector<8x96xf32>
    %158 = arith.mulf %157, %156 : vector<8x96xf32>
    %159 = math.tanh %158 : vector<8x96xf32>
    %cst_55 = arith.constant 1.000000e+00 : f32
    %160 = vector.broadcast %cst_55 : f32 to vector<8x96xf32>
    %161 = arith.addf %159, %160 : vector<8x96xf32>
    %cst_56 = arith.constant 5.000000e-01 : f32
    %162 = vector.broadcast %cst_56 : f32 to vector<8x96xf32>
    %163 = arith.mulf %162, %161 : vector<8x96xf32>
    %164 = vector.extract_strided_slice %163 {offsets = [0, 0], sizes = [8, 32], strides = [1, 1]} : vector<8x96xf32> to vector<8x32xf32>
    %165 = vector.extract_strided_slice %163 {offsets = [0, 32], sizes = [8, 32], strides = [1, 1]} : vector<8x96xf32> to vector<8x32xf32>
    %166 = vector.extract_strided_slice %163 {offsets = [0, 64], sizes = [8, 32], strides = [1, 1]} : vector<8x96xf32> to vector<8x32xf32>
    %167 = vector.extract_strided_slice %155 {offsets = [0, 96], sizes = [8, 32], strides = [1, 1]} : vector<8x128xf32> to vector<8x32xf32>
    %168 = math.tanh %167 : vector<8x32xf32>
    %169 = arith.mulf %165, %143 : vector<8x32xf32>
    %170 = arith.mulf %164, %168 : vector<8x32xf32>
    %171 = arith.addf %169, %170 : vector<8x32xf32>
    %172 = math.tanh %171 : vector<8x32xf32>
    %173 = arith.mulf %166, %172 : vector<8x32xf32>
    %174 = arith.index_cast %c5_i32 : i32 to index
    %c0_57 = arith.constant 0 : index
    %c0_58 = arith.constant 0 : index
    %175 = vector.load %arg4[%174, %c0_57, %c0_58] : memref<8x8x32xf32, #tpu.memory_space<vmem>>, vector<1x8x32xf32>
    %176 = vector.shape_cast %175 : vector<1x8x32xf32> to vector<8x32xf32>
    %177 = vector.shape_cast %173 : vector<8x32xf32> to vector<1x8x32xf32>
    tpu.vector_store %arg4[%174, %c0_57, %c0_58], %177 {strides = array<i32>} : memref<8x8x32xf32, #tpu.memory_space<vmem>>, vector<1x8x32xf32>,
    %c6_i32 = arith.constant 6 : i32
    %178 = arith.index_cast %c6_i32 : i32 to index
    %c0_59 = arith.constant 0 : index
    %c0_60 = arith.constant 0 : index
    %179 = vector.load %arg5[%178, %c0_59, %c0_60] : memref<8x8x128xf32, #tpu.memory_space<vmem>>, vector<1x8x128xf32>
    %180 = vector.shape_cast %179 : vector<1x8x128xf32> to vector<8x128xf32>
    %181 = arith.truncf %173 : vector<8x32xf32> to vector<8x32xbf16>
    %cst_61 = arith.constant dense<0.000000e+00> : vector<8x128xf32>
    %182 = tpu.matmul %181, %8, %cst_61 {dimension_numbers = #tpu.dot_dimension_numbers<[1], [0], [0], [1], [0, 0, 1, 1], [], []>} : vector<8x32xbf16>, vector<32x128xbf16>, vector<8x128xf32> -> vector<8x128xf32>
    %183 = arith.addf %180, %182 : vector<8x128xf32>
    %184 = vector.extract_strided_slice %183 {offsets = [0, 0], sizes = [8, 96], strides = [1, 1]} : vector<8x128xf32> to vector<8x96xf32>
    %cst_62 = arith.constant 5.000000e-01 : f32
    %185 = vector.broadcast %cst_62 : f32 to vector<8x96xf32>
    %186 = arith.mulf %185, %184 : vector<8x96xf32>
    %187 = math.tanh %186 : vector<8x96xf32>
    %cst_63 = arith.constant 1.000000e+00 : f32
    %188 = vector.broadcast %cst_63 : f32 to vector<8x96xf32>
    %189 = arith.addf %187, %188 : vector<8x96xf32>
    %cst_64 = arith.constant 5.000000e-01 : f32
    %190 = vector.broadcast %cst_64 : f32 to vector<8x96xf32>
    %191 = arith.mulf %190, %189 : vector<8x96xf32>
    %192 = vector.extract_strided_slice %191 {offsets = [0, 0], sizes = [8, 32], strides = [1, 1]} : vector<8x96xf32> to vector<8x32xf32>
    %193 = vector.extract_strided_slice %191 {offsets = [0, 32], sizes = [8, 32], strides = [1, 1]} : vector<8x96xf32> to vector<8x32xf32>
    %194 = vector.extract_strided_slice %191 {offsets = [0, 64], sizes = [8, 32], strides = [1, 1]} : vector<8x96xf32> to vector<8x32xf32>
    %195 = vector.extract_strided_slice %183 {offsets = [0, 96], sizes = [8, 32], strides = [1, 1]} : vector<8x128xf32> to vector<8x32xf32>
    %196 = math.tanh %195 : vector<8x32xf32>
    %197 = arith.mulf %193, %171 : vector<8x32xf32>
    %198 = arith.mulf %192, %196 : vector<8x32xf32>
    %199 = arith.addf %197, %198 : vector<8x32xf32>
    %200 = math.tanh %199 : vector<8x32xf32>
    %201 = arith.mulf %194, %200 : vector<8x32xf32>
    %202 = arith.index_cast %c6_i32 : i32 to index
    %c0_65 = arith.constant 0 : index
    %c0_66 = arith.constant 0 : index
    %203 = vector.load %arg4[%202, %c0_65, %c0_66] : memref<8x8x32xf32, #tpu.memory_space<vmem>>, vector<1x8x32xf32>
    %204 = vector.shape_cast %203 : vector<1x8x32xf32> to vector<8x32xf32>
    %205 = vector.shape_cast %201 : vector<8x32xf32> to vector<1x8x32xf32>
    tpu.vector_store %arg4[%202, %c0_65, %c0_66], %205 {strides = array<i32>} : memref<8x8x32xf32, #tpu.memory_space<vmem>>, vector<1x8x32xf32>,
    %c7_i32 = arith.constant 7 : i32
    %206 = arith.index_cast %c7_i32 : i32 to index
    %c0_67 = arith.constant 0 : index
    %c0_68 = arith.constant 0 : index
    %207 = vector.load %arg5[%206, %c0_67, %c0_68] : memref<8x8x128xf32, #tpu.memory_space<vmem>>, vector<1x8x128xf32>
    %208 = vector.shape_cast %207 : vector<1x8x128xf32> to vector<8x128xf32>
    %209 = arith.truncf %201 : vector<8x32xf32> to vector<8x32xbf16>
    %cst_69 = arith.constant dense<0.000000e+00> : vector<8x128xf32>
    %210 = tpu.matmul %209, %8, %cst_69 {dimension_numbers = #tpu.dot_dimension_numbers<[1], [0], [0], [1], [0, 0, 1, 1], [], []>} : vector<8x32xbf16>, vector<32x128xbf16>, vector<8x128xf32> -> vector<8x128xf32>
    %211 = arith.addf %208, %210 : vector<8x128xf32>
    %212 = vector.extract_strided_slice %211 {offsets = [0, 0], sizes = [8, 96], strides = [1, 1]} : vector<8x128xf32> to vector<8x96xf32>
    %cst_70 = arith.constant 5.000000e-01 : f32
    %213 = vector.broadcast %cst_70 : f32 to vector<8x96xf32>
    %214 = arith.mulf %213, %212 : vector<8x96xf32>
    %215 = math.tanh %214 : vector<8x96xf32>
    %cst_71 = arith.constant 1.000000e+00 : f32
    %216 = vector.broadcast %cst_71 : f32 to vector<8x96xf32>
    %217 = arith.addf %215, %216 : vector<8x96xf32>
    %cst_72 = arith.constant 5.000000e-01 : f32
    %218 = vector.broadcast %cst_72 : f32 to vector<8x96xf32>
    %219 = arith.mulf %218, %217 : vector<8x96xf32>
    %220 = vector.extract_strided_slice %219 {offsets = [0, 0], sizes = [8, 32], strides = [1, 1]} : vector<8x96xf32> to vector<8x32xf32>
    %221 = vector.extract_strided_slice %219 {offsets = [0, 32], sizes = [8, 32], strides = [1, 1]} : vector<8x96xf32> to vector<8x32xf32>
    %222 = vector.extract_strided_slice %219 {offsets = [0, 64], sizes = [8, 32], strides = [1, 1]} : vector<8x96xf32> to vector<8x32xf32>
    %223 = vector.extract_strided_slice %211 {offsets = [0, 96], sizes = [8, 32], strides = [1, 1]} : vector<8x128xf32> to vector<8x32xf32>
    %224 = math.tanh %223 : vector<8x32xf32>
    %225 = arith.mulf %221, %199 : vector<8x32xf32>
    %226 = arith.mulf %220, %224 : vector<8x32xf32>
    %227 = arith.addf %225, %226 : vector<8x32xf32>
    %228 = math.tanh %227 : vector<8x32xf32>
    %229 = arith.mulf %222, %228 : vector<8x32xf32>
    %230 = arith.index_cast %c7_i32 : i32 to index
    %c0_73 = arith.constant 0 : index
    %c0_74 = arith.constant 0 : index
    %231 = vector.load %arg4[%230, %c0_73, %c0_74] : memref<8x8x32xf32, #tpu.memory_space<vmem>>, vector<1x8x32xf32>
    %232 = vector.shape_cast %231 : vector<1x8x32xf32> to vector<8x32xf32>
    %233 = vector.shape_cast %229 : vector<8x32xf32> to vector<1x8x32xf32>
    tpu.vector_store %arg4[%230, %c0_73, %c0_74], %233 {strides = array<i32>} : memref<8x8x32xf32, #tpu.memory_space<vmem>>, vector<1x8x32xf32>,
    %c8_i32 = arith.constant 8 : i32
    return
  }
}

</mosaic_0001>

<bundles_post_ra>
// kernel: decoder_rnn_forward.3
= control target key start
LH: loop header
LB: loop body
LE: loop exit
PB: predicated region body
PF: predicated region fallthrough
CT: control target
= control target key end

     0   :  { %vm50_vm0 = vcmask 261120   ;;  %s252_s1 = inlined_call_operand.vmem [shape: bf16[32,128], index: 1, kind: input, shape index: {}]   ;;  %s253_s0 = inlined_call_operand.vmem [shape: f32[64,32], index: 0, kind: input, shape index: {}]   ;;  %s254_s2 = inlined_call_operand.vmem [shape: f32[1,128], index: 2, kind: input, shape index: {}]   ;;  %s255_s3 = inlined_call_operand.vmem [shape: f32[64,128], index: 3, kind: output, shape index: {}]  }
   0x1   :  { %v169_v0 = vld [vmem:[%s252_s1 + $0x8] sm:$0xff]   ;;  %v170_v1 = vld [vmem:[%s252_s1] sm:$0xff]   ;;  %v17_v7 = vld [vmem:[%s253_s0 + $0x10] sm:$0xff] }
   0x2   :  { %153 = vmatprep.subr.bf16.mxu0 %v169_v0  ;;  %165 = vmatprep.subr.bf16.mxu1 %v169_v0  ;;  %v15_v2 = vld [vmem:[%s253_s0] sm:$0xff]  ;;  %v16_v3 = vld [vmem:[%s253_s0 + $0x8] sm:$0xff]  ;;  %v18_v8 = vld [vmem:[%s253_s0 + $0x18] sm:$0xff] }
   0x3   :  { %v19_v4 = vld [vmem:[%s253_s0 + $0x20] sm:$0xff]  ;;  %154 = vmatpush3.bf16.msra.mxu0 %v169_v0  ;;  %167 = vmatpush3.bf16.msra.mxu1 %v169_v0  ;;  %v23_v5 = vpack.c.bf16 %v16_v3, %v15_v2  ;;  %v20_v6 = vld [vmem:[%s253_s0 + $0x28] sm:$0xff]  ;;  %v21_v10 = vld [vmem:[%s253_s0 + $0x30] sm:$0xff]  ;;  %v24_v12 = vpack.c.bf16 %v18_v8, %v17_v7 }
   0x4   :  { %155 = vmatprep.subr.bf16.mxu0 %v170_v1  ;;  %166 = vmatprep.subr.bf16.mxu1 %v170_v1  ;;  %v25_v9 = vpack.c.bf16 %v20_v6, %v19_v4  ;;  %v22_v11 = vld [vmem:[%s253_s0 + $0x38] sm:$0xff]  ;;  %v140_v14 = vld [vmem:[%s254_s2] ss:$0 sm:$0xff] }
   0x5   :  { %157 = vmatprep.mubr.msk.bf16.mxu0 %vm50_vm0, %v23_v5  ;;  %v26_v13 = vpack.c.bf16 %v22_v11, %v21_v10 }
   0x6   :  { %161 = vmatprep.mubr.msk.bf16.mxu1 %vm50_vm0, %v25_v9 }
   0x7   :  { %156 = vmatpush3.bf16.msra.mxu0 %v170_v1  ;;  %168 = vmatpush3.bf16.msra.mxu1 %v170_v1 }
   0xa   :  { %158 = vmatmul.mubr.msk.bf16.vlgmr.msra.gmra.mxu0 %vm50_vm0, %v24_v12  ;;  %162 = vmatmul.mubr.msk.bf16.vlgmr.msra.gmra.mxu1 %vm50_vm0, %v26_v13 }
  0xca   :  { %v159_v15 = vpop.f32.mrf.mxu0  ;;  %v163_v16 = vpop.f32.mrf.mxu1 }
  0xcb   :  { %v106_v17 = vadd.f32 %v159_v15, %v140_v14  ;;  %v122_v18 = vadd.f32 %v163_v16, %v140_v14 }
  0xcc   :  { %v97_v19 = vpop.f32.mrf.mxu0  ;;  %v113_v20 = vpop.f32.mrf.mxu1 }
  0xcd   :  { %130 = vst [vmem:[%s255_s3 + $0x10] sm:$0xff] %v106_v17  ;;  %134 = vst [vmem:[%s255_s3 + $0x30] sm:$0xff] %v122_v18  ;;  %v98_v21 = vadd.f32 %v140_v14, %v97_v19  ;;  %v114_v22 = vadd.f32 %v140_v14, %v113_v20 }
  0xce   :  { %v160_v23 = vpop.f32.mrf.mxu0  ;;  %v164_v24 = vpop.f32.mrf.mxu1 }
  0xcf   :  { %128 = vst [vmem:[%s255_s3] sm:$0xff] %v98_v21  ;;  %132 = vst [vmem:[%s255_s3 + $0x20] sm:$0xff] %v114_v22  ;;  %v109_v25 = vadd.f32 %v160_v23, %v140_v14  ;;  %v125_v26 = vadd.f32 %v164_v24, %v140_v14 }
  0xd0   :  { %v100_v27 = vpop.f32.mrf.mxu0  ;;  %v116_v28 = vpop.f32.mrf.mxu1 }
  0xd1   :  { %131 = vst [vmem:[%s255_s3 + $0x18] sm:$0xff] %v109_v25  ;;  %135 = vst [vmem:[%s255_s3 + $0x38] sm:$0xff] %v125_v26  ;;  %v101_v29 = vadd.f32 %v140_v14, %v100_v27  ;;  %v117_v30 = vadd.f32 %v140_v14, %v116_v28 }
  0xd3   :  { %129 = vst [vmem:[%s255_s3 + $0x8] sm:$0xff] %v101_v29  ;;  %133 = vst [vmem:[%s255_s3 + $0x28] sm:$0xff] %v117_v30 }

// kernel: decoder_rnn_forward.2
= control target key start
LH: loop header
LB: loop body
LE: loop exit
PB: predicated region body
PF: predicated region fallthrough
CT: control target
= control target key end

     0   :  { %v987_v0 = vmov 0.0   ;;  %vm988_vm0 = vmmov 0   ;;  %vm69_vm1 = vcmask 261120   ;;  %v989_v7 = vmov 0   ;;  %s990_s27 = smov 32   ;;  %s1236_s1 = inlined_call_operand.vmem [shape: bf16[32,128], index: 1, kind: input, shape index: {}]   ;;  %s1237_s2 = inlined_call_operand.vmem [shape: bf16[32,128], index: 2, kind: input, shape index: {}]   ;;  %s1238_s0 = inlined_call_operand.vmem [shape: bf16[64,32], index: 0, kind: input, shape index: {}]   ;;  %s1239_s3 = inlined_call_operand.vmem [shape: f32[1,128], index: 3, kind: input, shape index: {}]   ;;  %s1240_s4 = inlined_call_operand.vmem [shape: f32[8,8,32], index: 4, kind: output, shape index: {}]  }
   0x1   :  { %862 = vmatprep.subr.bf16.mxu1 %v987_v0  ;;  %v931_v1 = vld [vmem:[%s1236_s1 + $0x8] sm:$0xff]   ;;  %866 = vmatprep.mubr.msk.bf16.mxu1 %vm988_vm0, %v987_v0  ;;  %v933_v3 = vld [vmem:[%s1236_s1] sm:$0xff]   ;;  %v937_v50 = vld [vmem:[%s1238_s0 + $0x10] sm:$0xff]  }
   0x2   :  { %v1026_v2 = vld [vmem:[%s1237_s2 + $0x8] sm:$0xff]   ;;  %850 = vmatprep.subr.bf16.mxu0 %v931_v1  ;;  %v1035_v4 = vld [vmem:[%s1237_s2] sm:$0xff]   ;;  %v938_v51 = vld [vmem:[%s1238_s0 + $0x18] sm:$0xff]  }
   0x3   :  { %863 = vmatpush3.bf16.msra.mxu1 %v1026_v2  ;;  %851 = vmatpush3.bf16.msra.mxu0 %v931_v1  ;;  %v935_v5 = vld [vmem:[%s1238_s0] sm:$0xff]   ;;  %v936_v6 = vld [vmem:[%s1238_s0 + $0x8] sm:$0xff]  }
   0x4   :  { %864 = vmatprep.subr.bf16.mxu1 %v987_v0  ;;  %852 = vmatprep.subr.bf16.mxu0 %v933_v3  ;;  %v1064_v10 = vld [vmem:[%s1239_s3] ss:$0 sm:$0xff]  ;;  %s991_s3 = smov 64  }
   0x5   :  { %854 = vmatprep.mubr.msk.bf16.mxu0 %vm69_vm1, %v935_v5 }
   0x7   :  { %865 = vmatpush3.bf16.msra.mxu1 %v1035_v4  ;;  %853 = vmatpush3.bf16.msra.mxu0 %v933_v3 }
   0x8   :  { %870 = vmatprep.subr.bf16.mxu1 %v987_v0  ;;  %878 = vmatprep.subr.bf16.mxu0 %v987_v0 }
   0xa   :  { %867 = vmatmul.mubr.bf16.vlgmr.msra.gmra.mxu1 %v989_v7  ;;  %855 = vmatmul.mubr.msk.bf16.vlgmr.msra.gmra.mxu0 %vm69_vm1, %v936_v6 }
   0xb   :  { %871 = vmatpush3.bf16.msra.mxu1 %v1026_v2  ;;  %874 = vmatprep.mubr.msk.bf16.mxu1 %vm988_vm0, %v987_v0 }
   0xc   :  { %872 = vmatprep.subr.bf16.mxu1 %v987_v0  ;;  %879 = vmatpush3.bf16.msra.mxu0 %v1026_v2 }
   0xd   :  { %880 = vmatprep.subr.bf16.mxu0 %v987_v0  ;;  %858 = vmatprep.mubr.msk.bf16.mxu0 %vm69_vm1, %v937_v50 }
   0xf   :  { %873 = vmatpush3.bf16.msra.mxu1 %v1035_v4 }
  0x10   :  { %881 = vmatpush3.bf16.msra.mxu0 %v1035_v4  ;;  %886 = vmatprep.subr.bf16.mxu1 %v987_v0 }
  0x11   :  { %894 = vmatprep.subr.bf16.mxu0 %v987_v0 }
  0x12   :  { %859 = vmatmul.mubr.msk.bf16.gmra.mxu0 %vm69_vm1, %v938_v51 }
  0x13   :  { %882 = vmatprep.mubr.msk.bf16.mxu0 %vm988_vm0, %v987_v0 }
  0xca   :  { %v209_v8 = vpop.f32.mrf.mxu1  ;;  %v1059_v9 = vpop.f32.mrf.mxu0 }
  0xcb   :  { %v125_v61 = vadd.f32 %v1059_v9, %v1064_v10 }
  0xcc   :  { %v868_v11 = vpop.f32.mrf.mxu1  ;;  %v116_v12 = vpop.f32.mrf.mxu0 }
  0xcd   :  { %v117_v13 = vadd.f32 %v1064_v10, %v116_v12 }
  0xce   :  { %v212_v14 = vpop.f32.mrf.mxu1  ;;  %v1082_v32 = vpop.f32.mrf.mxu0 }
  0xcf   :  { %v215_v15 = vadd.f32 %v209_v8, %v117_v13 }
  0xd0   :  { %v869_v16 = vpop.f32.mrf.mxu1  ;;  %v119_v33 = vpop.f32.mrf.mxu0 }
  0xd1   :  { %939 = vtanh.f32 %v215_v15  ;;  %v216_v18 = vmul.f32 0.5, %v215_v15  ;;  %v120_v34 = vadd.f32 %v1064_v10, %v119_v33 }
  0xd2   :  { %v1110_v57 = vpop.f32.mrf.mxu0 }
  0xd3   :  { %941 = vtanh.f32 %v216_v18 }
  0xd4   :  { %v1112_v58 = vpop.f32.mrf.mxu0 }
  0xd6   :  { %v1114_v59 = vpop.f32.mrf.mxu0 }
  0xd8   :  { %v1116_v60 = vpop.f32.mrf.mxu0 }
  0xde   :  { %v940_v17 = vpop.eup %939 }
  0xdf   :  { %223 = vrot.lane.b32.xlu0 %v940_v17, %s990_s27 }
  0xe0   :  { %v942_v19 = vpop.eup %941 }
  0xe1   :  { %v218_v20 = vadd.f32 1.0, %v942_v19 }
  0xe3   :  { %v219_v21 = vmul.f32 0.5, %v218_v20 }
  0xe5   :  { %v221_v24 = vmul.f32 0.0, %v219_v21 }
 0x151   :  { %v224_v22 = vpop.permute.xlu0 %223 }
 0x152   :  { %v226_v23 = vmul.f32 %v224_v22, %v219_v21  ;;  %v128_v22 = vadd.f32 %v1082_v32, %v1064_v10 }
 0x154   :  { %228 = vrot.lane.b32.xlu0 %v226_v23, %s990_s27 }
 0x1c6   :  { %v229_v25 = vpop.permute.xlu0 %228 }
 0x1c7   :  { %v231_v26 = vadd.f32 %v229_v25, %v221_v24 }
 0x1c9   :  { %943 = vtanh.f32 %v231_v26 }
 0x1d6   :  { %v944_v27 = vpop.eup %943 }
 0x1d7   :  { %234 = vrot.lane.b32.xlu1 %v944_v27, %s990_s27 }
 0x249   :  { %v235_v28 = vpop.permute.xlu1 %234 }
 0x24a   :  { %v1070_v29 = vmul.f32 %v235_v28, %v219_v21 }
 0x24c   :  { %v245_v30 = vpack.c.bf16 %v1070_v29, %v1070_v29 }
 0x24e   :  { %247 = vrot.lane.b32.xlu1 %v245_v30, %s991_s3 }
 0x2c0   :  { %v248_v31 = vpop.permute.xlu1 %247 }
 0x2c1   :  { %875 = vmatmul.mubr.msk.bf16.vlgmr.msra.gmra.mxu1 %vm69_vm1, %v248_v31 }
 0x2c2   :  { %887 = vmatpush3.bf16.msra.mxu1 %v1026_v2  ;;  %890 = vmatprep.mubr.msk.bf16.mxu1 %vm988_vm0, %v987_v0 }
 0x2c3   :  { %888 = vmatprep.subr.bf16.mxu1 %v987_v0 }
 0x2c6   :  { %889 = vmatpush3.bf16.msra.mxu1 %v1035_v4 }
 0x2c7   :  { %902 = vmatprep.subr.bf16.mxu1 %v987_v0 }
 0x381   :  { %v286_v35 = vpop.f32.mrf.mxu1 }
 0x382   :  { %v292_v36 = vadd.f32 %v286_v35, %v120_v34 }
 0x383   :  { %v876_v37 = vpop.f32.mrf.mxu1 }
 0x384   :  { %945 = vtanh.f32 %v292_v36  ;;  %v293_v41 = vmul.f32 0.5, %v292_v36 }
 0x385   :  { %v289_v38 = vpop.f32.mrf.mxu1 }
 0x386   :  { %947 = vtanh.f32 %v293_v41 }
 0x387   :  { %v877_v39 = vpop.f32.mrf.mxu1 }
 0x391   :  { %v946_v40 = vpop.eup %945 }
 0x392   :  { %300 = vrot.lane.b32.xlu0 %v946_v40, %s990_s27 }
 0x393   :  { %v948_v42 = vpop.eup %947 }
 0x394   :  { %v295_v43 = vadd.f32 1.0, %v948_v42 }
 0x396   :  { %v296_v44 = vmul.f32 0.5, %v295_v43 }
 0x398   :  { %v298_v47 = vmul.f32 %v296_v44, %v231_v26 }
 0x404   :  { %v301_v45 = vpop.permute.xlu0 %300 }
 0x405   :  { %v303_v46 = vmul.f32 %v301_v45, %v296_v44 }
 0x407   :  { %305 = vrot.lane.b32.xlu1 %v303_v46, %s990_s27 }
 0x479   :  { %v306_v48 = vpop.permute.xlu1 %305 }
 0x47a   :  { %v308_v49 = vadd.f32 %v306_v48, %v298_v47 }
 0x47c   :  { %949 = vtanh.f32 %v308_v49 }
 0x489   :  { %v950_v52 = vpop.eup %949 }
 0x48a   :  { %311 = vrot.lane.b32.xlu0 %v950_v52, %s990_s27 }
 0x4fc   :  { %v312_v53 = vpop.permute.xlu0 %311 }
 0x4fd   :  { %v1098_v54 = vmul.f32 %v312_v53, %v296_v44  ;;  %v133_v44 = vadd.f32 %v1064_v10, %v1112_v58 }
 0x4ff   :  { %v323_v55 = vpack.c.bf16 %v1098_v54, %v1098_v54 }
 0x501   :  { %325 = vrot.lane.b32.xlu1 %v323_v55, %s991_s3 }
 0x573   :  { %v326_v56 = vpop.permute.xlu1 %325 }
 0x574   :  { %883 = vmatmul.mubr.msk.bf16.vlgmr.msra.gmra.mxu0 %vm69_vm1, %v326_v56 }
 0x575   :  { %895 = vmatpush3.bf16.msra.mxu0 %v1026_v2  ;;  %898 = vmatprep.mubr.msk.bf16.mxu0 %vm988_vm0, %v987_v0 }
 0x576   :  { %896 = vmatprep.subr.bf16.mxu0 %v987_v0 }
 0x579   :  { %897 = vmatpush3.bf16.msra.mxu0 %v1035_v4 }
 0x57a   :  { %910 = vmatprep.subr.bf16.mxu0 %v987_v0 }
 0x634   :  { %v364_v62 = vpop.f32.mrf.mxu0 }
 0x635   :  { %v370_v63 = vadd.f32 %v364_v62, %v125_v61 }
 0x636   :  { %v884_v1 = vpop.f32.mrf.mxu0 }
 0x637   :  { %951 = vtanh.f32 %v370_v63  ;;  %v371_v7 = vmul.f32 0.5, %v370_v63 }
 0x638   :  { %v367_v3 = vpop.f32.mrf.mxu0 }
 0x639   :  { %953 = vtanh.f32 %v371_v7 }
 0x63a   :  { %v885_v5 = vpop.f32.mrf.mxu0 }
 0x644   :  { %v952_v6 = vpop.eup %951 }
 0x645   :  { %378 = vrot.lane.b32.xlu0 %v952_v6, %s990_s27 }
 0x646   :  { %v954_v8 = vpop.eup %953 }
 0x647   :  { %v373_v11 = vadd.f32 1.0, %v954_v8  ;;  %v136_v8 = vadd.f32 %v1064_v10, %v1116_v60 }
 0x649   :  { %v374_v12 = vmul.f32 0.5, %v373_v11 }
 0x64b   :  { %v376_v15 = vmul.f32 %v374_v12, %v308_v49 }
 0x6b7   :  { %v379_v13 = vpop.permute.xlu0 %378 }
 0x6b8   :  { %v381_v14 = vmul.f32 %v379_v13, %v374_v12 }
 0x6ba   :  { %383 = vrot.lane.b32.xlu1 %v381_v14, %s990_s27 }
 0x72c   :  { %v384_v9 = vpop.permute.xlu1 %383 }
 0x72d   :  { %v386_v16 = vadd.f32 %v384_v9, %v376_v15 }
 0x72f   :  { %955 = vtanh.f32 %v386_v16 }
 0x73c   :  { %v956_v17 = vpop.eup %955 }
 0x73d   :  { %389 = vrot.lane.b32.xlu0 %v956_v17, %s990_s27 }
 0x7af   :  { %v390_v18 = vpop.permute.xlu0 %389 }
 0x7b0   :  { %v1123_v19 = vmul.f32 %v390_v18, %v374_v12 }
 0x7b2   :  { %v401_v20 = vpack.c.bf16 %v1123_v19, %v1123_v19 }
 0x7b4   :  { %403 = vrot.lane.b32.xlu1 %v401_v20, %s991_s3 }
 0x826   :  { %v404_v21 = vpop.permute.xlu1 %403 }
 0x827   :  { %891 = vmatmul.mubr.msk.bf16.vlgmr.msra.gmra.mxu1 %vm69_vm1, %v404_v21 }
 0x828   :  { %903 = vmatpush3.bf16.msra.mxu1 %v1026_v2  ;;  %906 = vmatprep.mubr.msk.bf16.mxu1 %vm988_vm0, %v987_v0 }
 0x829   :  { %904 = vmatprep.subr.bf16.mxu1 %v987_v0 }
 0x82c   :  { %905 = vmatpush3.bf16.msra.mxu1 %v1035_v4 }
 0x82d   :  { %918 = vmatprep.subr.bf16.mxu1 %v987_v0 }
 0x8e7   :  { %v442_v23 = vpop.f32.mrf.mxu1 }
 0x8e8   :  { %v448_v24 = vadd.f32 %v442_v23, %v128_v22 }
 0x8e9   :  { %v892_v25 = vpop.f32.mrf.mxu1 }
 0x8ea   :  { %957 = vtanh.f32 %v448_v24  ;;  %v449_v30 = vmul.f32 0.5, %v448_v24 }
 0x8eb   :  { %v445_v26 = vpop.f32.mrf.mxu1 }
 0x8ec   :  { %959 = vtanh.f32 %v449_v30 }
 0x8ed   :  { %v893_v27 = vpop.f32.mrf.mxu1 }
 0x8ee   :  { %v141_v27 = vadd.f32 %v1110_v57, %v1064_v10 }
 0x8f7   :  { %v958_v28 = vpop.eup %957 }
 0x8f8   :  { %456 = vrot.lane.b32.xlu0 %v958_v28, %s990_s27 }
 0x8f9   :  { %v960_v31 = vpop.eup %959 }
 0x8fa   :  { %v451_v33 = vadd.f32 1.0, %v960_v31 }
 0x8fc   :  { %v452_v34 = vmul.f32 0.5, %v451_v33 }
 0x8fe   :  { %v454_v37 = vmul.f32 %v452_v34, %v386_v16 }
 0x96a   :  { %v457_v35 = vpop.permute.xlu0 %456 }
 0x96b   :  { %v459_v36 = vmul.f32 %v457_v35, %v452_v34 }
 0x96d   :  { %461 = vrot.lane.b32.xlu1 %v459_v36, %s990_s27 }
 0x9df   :  { %v462_v32 = vpop.permute.xlu1 %461 }
 0x9e0   :  { %v464_v38 = vadd.f32 %v462_v32, %v454_v37 }
 0x9e2   :  { %961 = vtanh.f32 %v464_v38 }
 0x9ef   :  { %v962_v39 = vpop.eup %961 }
 0x9f0   :  { %467 = vrot.lane.b32.xlu0 %v962_v39, %s990_s27 }
 0xa62   :  { %v468_v40 = vpop.permute.xlu0 %467 }
 0xa63   :  { %v1140_v41 = vmul.f32 %v468_v40, %v452_v34 }
 0xa65   :  { %v479_v42 = vpack.c.bf16 %v1140_v41, %v1140_v41 }
 0xa67   :  { %481 = vrot.lane.b32.xlu1 %v479_v42, %s991_s3 }
 0xad9   :  { %v482_v43 = vpop.permute.xlu1 %481 }
 0xada   :  { %899 = vmatmul.mubr.msk.bf16.vlgmr.msra.gmra.mxu0 %vm69_vm1, %v482_v43 }
 0xadb   :  { %911 = vmatpush3.bf16.msra.mxu0 %v1026_v2  ;;  %914 = vmatprep.mubr.msk.bf16.mxu0 %vm988_vm0, %v987_v0 }
 0xadc   :  { %912 = vmatprep.subr.bf16.mxu0 %v987_v0 }
 0xadf   :  { %913 = vmatpush3.bf16.msra.mxu0 %v1035_v4 }
 0xb9a   :  { %v520_v45 = vpop.f32.mrf.mxu0 }
 0xb9b   :  { %v526_v46 = vadd.f32 %v520_v45, %v133_v44 }
 0xb9c   :  { %v900_v47 = vpop.f32.mrf.mxu0 }
 0xb9d   :  { %963 = vtanh.f32 %v526_v46  ;;  %v527_v51 = vmul.f32 0.5, %v526_v46 }
 0xb9e   :  { %v523_v48 = vpop.f32.mrf.mxu0 }
 0xb9f   :  { %965 = vtanh.f32 %v527_v51 }
 0xba0   :  { %v901_v49 = vpop.f32.mrf.mxu0 }
 0xba1   :  { %v144_v49 = vadd.f32 %v1114_v59, %v1064_v10 }
 0xbaa   :  { %v964_v50 = vpop.eup %963 }
 0xbab   :  { %534 = vrot.lane.b32.xlu0 %v964_v50, %s990_s27 }
 0xbac   :  { %v966_v52 = vpop.eup %965 }
 0xbad   :  { %v529_v53 = vadd.f32 1.0, %v966_v52 }
 0xbaf   :  { %v530_v55 = vmul.f32 0.5, %v529_v53 }
 0xbb1   :  { %v532_v62 = vmul.f32 %v530_v55, %v464_v38 }
 0xc1d   :  { %v535_v56 = vpop.permute.xlu0 %534 }
 0xc1e   :  { %v537_v61 = vmul.f32 %v535_v56, %v530_v55 }
 0xc20   :  { %539 = vrot.lane.b32.xlu1 %v537_v61, %s990_s27 }
 0xc92   :  { %v540_v58 = vpop.permute.xlu1 %539 }
 0xc93   :  { %v542_v63 = vadd.f32 %v540_v58, %v532_v62 }
 0xc95   :  { %967 = vtanh.f32 %v542_v63 }
 0xca2   :  { %v968_v1 = vpop.eup %967 }
 0xca3   :  { %545 = vrot.lane.b32.xlu0 %v968_v1, %s990_s27 }
 0xd15   :  { %v546_v3 = vpop.permute.xlu0 %545 }
 0xd16   :  { %v1156_v5 = vmul.f32 %v546_v3, %v530_v55 }
 0xd18   :  { %v557_v6 = vpack.c.bf16 %v1156_v5, %v1156_v5 }
 0xd1a   :  { %559 = vrot.lane.b32.xlu1 %v557_v6, %s991_s3 }
 0xd8c   :  { %v560_v7 = vpop.permute.xlu1 %559 }
 0xd8d   :  { %907 = vmatmul.mubr.msk.bf16.vlgmr.msra.gmra.mxu1 %vm69_vm1, %v560_v7 }
 0xd8e   :  { %919 = vmatpush3.bf16.msra.mxu1 %v1026_v2  ;;  %922 = vmatprep.mubr.msk.bf16.mxu1 %vm988_vm0, %v987_v0 }
 0xd8f   :  { %920 = vmatprep.subr.bf16.mxu1 %v987_v0 }
 0xd92   :  { %921 = vmatpush3.bf16.msra.mxu1 %v1035_v4 }
 0xe4d   :  { %v598_v11 = vpop.f32.mrf.mxu1 }
 0xe4e   :  { %v604_v12 = vadd.f32 %v598_v11, %v136_v8 }
 0xe4f   :  { %v908_v13 = vpop.f32.mrf.mxu1 }
 0xe50   :  { %969 = vtanh.f32 %v604_v12  ;;  %v605_v2 = vmul.f32 0.5, %v604_v12 }
 0xe51   :  { %v601_v14 = vpop.f32.mrf.mxu1 }
 0xe52   :  { %971 = vtanh.f32 %v605_v2 }
 0xe53   :  { %v909_v15 = vpop.f32.mrf.mxu1 }
 0xe5d   :  { %v970_v9 = vpop.eup %969 }
 0xe5e   :  { %612 = vrot.lane.b32.xlu0 %v970_v9, %s990_s27 }
 0xe5f   :  { %v972_v16 = vpop.eup %971 }
 0xe60   :  { %v607_v17 = vadd.f32 1.0, %v972_v16 }
 0xe62   :  { %v608_v18 = vmul.f32 0.5, %v607_v17 }
 0xe64   :  { %v610_v4 = vmul.f32 %v608_v18, %v542_v63 }
 0xed0   :  { %v613_v0 = vpop.permute.xlu0 %612 }
 0xed1   :  { %v615_v20 = vmul.f32 %v613_v0, %v608_v18 }
 0xed3   :  { %617 = vrot.lane.b32.xlu1 %v615_v20, %s990_s27 }
 0xf45   :  { %v618_v60 = vpop.permute.xlu1 %617 }
 0xf46   :  { %v620_v21 = vadd.f32 %v618_v60, %v610_v4 }
 0xf48   :  { %973 = vtanh.f32 %v620_v21 }
 0xf55   :  { %v974_v22 = vpop.eup %973 }
 0xf56   :  { %623 = vrot.lane.b32.xlu0 %v974_v22, %s990_s27 }
 0xfc8   :  { %v624_v23 = vpop.permute.xlu0 %623 }
 0xfc9   :  { %v1172_v24 = vmul.f32 %v624_v23, %v608_v18 }
 0xfcb   :  { %v635_v25 = vpack.c.bf16 %v1172_v24, %v1172_v24 }
 0xfcd   :  { %637 = vrot.lane.b32.xlu1 %v635_v25, %s991_s3 }
0x103f   :  { %v638_v26 = vpop.permute.xlu1 %637 }
0x1040   :  { %915 = vmatmul.mubr.msk.bf16.vlgmr.msra.gmra.mxu0 %vm69_vm1, %v638_v26 }
0x1100   :  { %v676_v28 = vpop.f32.mrf.mxu0 }
0x1101   :  { %v682_v30 = vadd.f32 %v676_v28, %v141_v27 }
0x1102   :  { %v916_v31 = vpop.f32.mrf.mxu0 }
0x1103   :  { %975 = vtanh.f32 %v682_v30  ;;  %v683_v36 = vmul.f32 0.5, %v682_v30 }
0x1104   :  { %v679_v33 = vpop.f32.mrf.mxu0 }
0x1105   :  { %977 = vtanh.f32 %v683_v36 }
0x1106   :  { %v917_v34 = vpop.f32.mrf.mxu0 }
0x1110   :  { %v976_v35 = vpop.eup %975 }
0x1111   :  { %690 = vrot.lane.b32.xlu0 %v976_v35, %s990_s27 }
0x1112   :  { %v978_v37 = vpop.eup %977 }
0x1113   :  { %v685_v32 = vadd.f32 1.0, %v978_v37 }
0x1115   :  { %v686_v38 = vmul.f32 0.5, %v685_v32 }
0x1117   :  { %v688_v42 = vmul.f32 %v686_v38, %v620_v21 }
0x1183   :  { %v691_v39 = vpop.permute.xlu0 %690 }
0x1184   :  { %v693_v40 = vmul.f32 %v691_v39, %v686_v38 }
0x1186   :  { %695 = vrot.lane.b32.xlu1 %v693_v40, %s990_s27 }
0x11f8   :  { %v696_v57 = vpop.permute.xlu1 %695 }
0x11f9   :  { %v698_v43 = vadd.f32 %v696_v57, %v688_v42 }
0x11fb   :  { %979 = vtanh.f32 %v698_v43 }
0x1208   :  { %v980_v44 = vpop.eup %979 }
0x1209   :  { %701 = vrot.lane.b32.xlu0 %v980_v44, %s990_s27 }
0x127b   :  { %v702_v45 = vpop.permute.xlu0 %701 }
0x127c   :  { %v704_v46 = vmul.f32 %v702_v45, %v686_v38 }
0x127e   :  { %v713_v47 = vpack.c.bf16 %v704_v46, %v704_v46 }
0x1280   :  { %715 = vrot.lane.b32.xlu1 %v713_v47, %s991_s3 }
0x12f2   :  { %v716_v48 = vpop.permute.xlu1 %715 }
0x12f3   :  { %923 = vmatmul.mubr.msk.bf16.vlgmr.msra.gmra.mxu1 %vm69_vm1, %v716_v48 }
0x13b3   :  { %v754_v50 = vpop.f32.mrf.mxu1 }
0x13b4   :  { %v760_v51 = vadd.f32 %v754_v50, %v144_v49 }
0x13b5   :  { %v924_v52 = vpop.f32.mrf.mxu1 }
0x13b6   :  { %981 = vtanh.f32 %v760_v51  ;;  %v761_v61 = vmul.f32 0.5, %v760_v51 }
0x13b7   :  { %v757_v53 = vpop.f32.mrf.mxu1 }
0x13b8   :  { %983 = vtanh.f32 %v761_v61 }
0x13b9   :  { %v925_v55 = vpop.f32.mrf.mxu1 }
0x13c3   :  { %v982_v56 = vpop.eup %981 }
0x13c4   :  { %768 = vrot.lane.b32.xlu0 %v982_v56, %s990_s27 }
0x13c5   :  { %v984_v62 = vpop.eup %983 }
0x13c6   :  { %v763_v58 = vadd.f32 1.0, %v984_v62 }
0x13c8   :  { %v764_v63 = vmul.f32 0.5, %v763_v58 }
0x13ca   :  { %v766_v10 = vmul.f32 %v764_v63, %v698_v43 }
0x1436   :  { %v769_v1 = vpop.permute.xlu0 %768 }
0x1437   :  { %v771_v3 = vmul.f32 %v769_v1, %v764_v63 }
0x1439   :  { %773 = vrot.lane.b32.xlu1 %v771_v3, %s990_s27 }
0x143d   :  { %239 = vrot.lane.b32.xlu1 %v1070_v29, %s991_s3 }
0x1441   :  { %394 = vrot.lane.b32.xlu1 %v1123_v19, %s991_s3 }
0x1445   :  { %550 = vrot.lane.b32.xlu1 %v1156_v5, %s991_s3 }
0x1449   :  { %706 = vrot.lane.b32.xlu1 %v704_v46, %s991_s3 }
0x14ab   :  { %v774_v59 = vpop.permute.xlu1 %773 }
0x14ac   :  { %v776_v6 = vadd.f32 %v774_v59, %v766_v10 }
0x14ae   :  { %985 = vtanh.f32 %v776_v6 }
0x14af   :  { %v240_v7 = vpop.permute.xlu1 %239 }
0x14b0   :  { %242 = vst.msk [vmem:[%s1240_s4] sm:$0xff] %vm69_vm1, %v240_v7 }
0x14b3   :  { %v395_v8 = vpop.permute.xlu1 %394 }
0x14b4   :  { %809 = vst.msk [vmem:[%s1240_s4 + $0x10] sm:$0xff] %vm69_vm1, %v395_v8 }
0x14b7   :  { %v551_v29 = vpop.permute.xlu1 %550 }
0x14b8   :  { %813 = vst.msk [vmem:[%s1240_s4 + $0x20] sm:$0xff] %vm69_vm1, %v551_v29 }
0x14bb   :  { %v986_v19 = vpop.eup %985  ;;  %v707_v5 = vpop.permute.xlu1 %706 }
0x14bc   :  { %817 = vst.msk [vmem:[%s1240_s4 + $0x30] sm:$0xff] %vm69_vm1, %v707_v5  ;;  %779 = vrot.lane.b32.xlu0 %v986_v19, %s990_s27 }
0x14c0   :  { %316 = vrot.lane.b32.xlu0 %v1098_v54, %s991_s3 }
0x14c4   :  { %472 = vrot.lane.b32.xlu0 %v1140_v41, %s991_s3 }
0x14c8   :  { %628 = vrot.lane.b32.xlu0 %v1172_v24, %s991_s3 }
0x152e   :  { %v780_v11 = vpop.permute.xlu0 %779 }
0x152f   :  { %v782_v12 = vmul.f32 %v780_v11, %v764_v63 }
0x1531   :  { %784 = vrot.lane.b32.xlu0 %v782_v12, %s991_s3 }
0x1532   :  { %v317_v13 = vpop.permute.xlu0 %316 }
0x1533   :  { %807 = vst.msk [vmem:[%s1240_s4 + $0x8] sm:$0xff] %vm69_vm1, %v317_v13 }
0x1536   :  { %v473_v14 = vpop.permute.xlu0 %472 }
0x1537   :  { %811 = vst.msk [vmem:[%s1240_s4 + $0x18] sm:$0xff] %vm69_vm1, %v473_v14 }
0x153a   :  { %v629_v54 = vpop.permute.xlu0 %628 }
0x153b   :  { %815 = vst.msk [vmem:[%s1240_s4 + $0x28] sm:$0xff] %vm69_vm1, %v629_v54 }
0x15a3   :  { %v785_v41 = vpop.permute.xlu0 %784 }
0x15a4   :  { %819 = vst.msk [vmem:[%s1240_s4 + $0x38] sm:$0xff] %vm69_vm1, %v785_v41 }

</bundles_post_ra>
